<compile_context>
chip_gen: v5e
topology: v5e:2x2
jax: 0.10.0
libtpu: 0.0.40
codegen_flags: <defaults>
</compile_context>

<pallas_src>
import functools

import jax
import jax.numpy as jnp
from jax import lax
from jax.experimental import pallas as pl
from jax.experimental.pallas import tpu as pltpu


def _round_up(a, b):
    return (a + b - 1) // b * b


def _conv_gemm_kernel(p_ref, w_ref, b_ref, o_ref):
    # p_ref: (K, TM)    im2col patches for this (batch, M-tile)
    # w_ref: (Cout, K)  resident weight
    # b_ref: (Cout, 1)  resident bias
    # o_ref: (Cout, TM) lane-dense output tile, already in NCDHW flat order
    acc = jnp.dot(w_ref[...], p_ref[...], preferred_element_type=jnp.float32)
    o_ref[...] = (acc + b_ref[...]).astype(o_ref.dtype)


def blockwise_conv3d(x, weight, bias, stride, padding, block_step=(15, 15, 15),
                     tm_cap=4096):
    """Equivalent of BlockwiseConv3d.forward.

    x:      (B, Cin, T, H, W)  float32 (NCDHW, PyTorch convention)
    weight: (Cout, Cin, kT, kH, kW)
    bias:   (Cout,)
    block_step only affects the PyTorch tiling schedule, not the result.
    """
    del block_step  # schedule-only parameter; result is independent of it
    sT, sH, sW = stride
    pT, pH, pW = padding
    C_out, C_in, kT, kH, kW = weight.shape
    B = x.shape[0]

    # Same padding as the module's F.pad with reversed repeat_interleave.
    xp = jnp.pad(x, ((0, 0), (0, 0), (pT, pT), (pH, pH), (pW, pW)))
    Tp, Hp, Wp = xp.shape[2], xp.shape[3], xp.shape[4]
    T_out = (Tp - kT) // sT + 1
    H_out = (Hp - kH) // sH + 1
    W_out = (Wp - kW) // sW + 1

    # ---- wrapper-side im2col (XLA layout glue, not the hot path) ----
    # Dense (B, K, M) patch matrix:
    #   K index = (kt, kh, kw, cin), cin fastest
    #   M index = (t, h, w), w fastest (== NCDHW output flattening)
    K = kT * kH * kW * C_in
    M = T_out * H_out * W_out
    taps = []
    for kt in range(kT):
        for kh in range(kH):
            for kw in range(kW):
                taps.append(lax.slice(
                    xp,
                    (0, 0, kt, kh, kw),
                    (B, C_in,
                     kt + sT * (T_out - 1) + 1,
                     kh + sH * (H_out - 1) + 1,
                     kw + sW * (W_out - 1) + 1),
                    (1, 1, sT, sH, sW)))  # each: (B, Cin, T_out, H_out, W_out)
    patches = jnp.stack(taps, axis=1).reshape(B, K, M)

    # Tile M on the lane axis; keep every block a multiple of 128 lanes.
    TM = min(_round_up(M, 128), tm_cap)
    M_pad = _round_up(M, TM)
    if M_pad != M:
        patches = jnp.pad(patches, ((0, 0), (0, 0), (0, M_pad - M)))

    # (Cout, Cin, kT, kH, kW) -> (Cout, K) with K ordered (kt, kh, kw, cin),
    # matching the patch matrix's K ordering.
    w2 = jnp.transpose(weight, (0, 2, 3, 4, 1)).reshape(C_out, K)
    b2 = bias.reshape(C_out, 1)

    flops = 2 * B * M * K * C_out
    bytes_accessed = 4 * (B * K * M_pad            # patches, read once
                          + C_out * K + C_out      # resident weight + bias
                          + B * C_out * M_pad)     # output, written once

    # VMEM: double-buffered patch + output tiles, resident weight/bias.
    vmem_est = 4 * (2 * _round_up(K, 8) * TM
                    + 2 * _round_up(C_out, 8) * TM
                    + _round_up(C_out, 8) * _round_up(K, 128)
                    + _round_up(C_out, 8) * 128)
    vmem_limit = int(min(max(2 * vmem_est, 4 << 20), 64 << 20))

    out = pl.pallas_call(
        _conv_gemm_kernel,
        out_shape=jax.ShapeDtypeStruct((B, C_out, M_pad), x.dtype),
        grid_spec=pltpu.PrefetchScalarGridSpec(
            num_scalar_prefetch=0,
            grid=(B, M_pad // TM),
            in_specs=[
                # one dense (K, TM) patch tile per step, pipelined
                pl.BlockSpec((None, K, TM), lambda b, m: (b, 0, m)),
                # weight, fully resident (constant index_map)
                pl.BlockSpec((C_out, K), lambda b, m: (0, 0)),
                # bias, fully resident
                pl.BlockSpec((C_out, 1), lambda b, m: (0, 0)),
            ],
            out_specs=pl.BlockSpec((None, C_out, TM), lambda b, m: (b, 0, m)),
        ),
        compiler_params=pltpu.CompilerParams(
            dimension_semantics=("parallel", "parallel"),
            vmem_limit_bytes=vmem_limit),
        cost_estimate=pl.CostEstimate(flops=flops, transcendentals=0,
                                      bytes_accessed=bytes_accessed),
    )(patches, w2, b2)

    # (B, Cout, M_pad) -> NCDHW, matching the PyTorch module.
    return out[:, :, :M].reshape(B, C_out, T_out, H_out, W_out)


if __name__ == "__main__":
    key = jax.random.PRNGKey(0)
    kx, kw, kb = jax.random.split(key, 3)

    # Module hyper-parameters (small, consistent with BlockwiseConv3d.__init__).
    chan_in, chan_out = 4, 8
    kernel_size = (3, 3, 3)
    stride = (1, 2, 2)
    padding = (1, 1, 1)
    block_step = (2, 3, 3)   # irrelevant to the result; kept for fidelity

    B, T, H, W = 2, 8, 16, 16
    x = jax.random.normal(kx, (B, chan_in, T, H, W), jnp.float32)
    weight = 0.1 * jax.random.normal(
        kw, (chan_out, chan_in) + kernel_size, jnp.float32)
    bias = jax.random.normal(kb, (chan_out,), jnp.float32)

    fn = jax.jit(functools.partial(
        blockwise_conv3d, stride=stride, padding=padding,
        block_step=block_step))
    out = jax.block_until_ready(fn(x, weight, bias))

    # Reference: plain padded+strided conv3d (what the blockwise loop computes).
    ref = lax.conv_general_dilated(
        x, weight,
        window_strides=stride,
        padding=[(p, p) for p in padding],
        dimension_numbers=("NCDHW", "OIDHW", "NCDHW"),
    ) + bias[None, :, None, None, None]

    assert out.shape == ref.shape, (out.shape, ref.shape)
    err = float(jnp.max(jnp.abs(out - ref)))
    assert jnp.allclose(out, ref, atol=1e-4, rtol=1e-4), err
    print("KERNEL_OK")
</pallas_src>

<mosaic_0001>
module attributes {stable_mosaic.version = 11 : i64} {
  func.func @_conv_gemm_kernel(%arg0: i32, %arg1: i32, %arg2: memref<1x108x512xf32, #tpu.memory_space<vmem>>, %arg3: memref<8x108xf32, #tpu.memory_space<vmem>>, %arg4: memref<8x1xf32, #tpu.memory_space<vmem>>, %arg5: memref<1x8x512xf32, #tpu.memory_space<vmem>>) attributes {dimension_semantics = [#tpu.dimension_semantics<parallel>, #tpu.dimension_semantics<parallel>], iteration_bounds = array<i64: 2, 1>, scalar_prefetch = 0 : i64, scratch_operands = 0 : i64, tpu.core_type = #tpu.core_type<tc>, window_params = [{transform_indices = @transform_0, window_bounds = array<i64: 1, 108, 512>}, {pipeline_mode = #tpu.pipeline_mode<synchronous>, transform_indices = @transform_1, window_bounds = array<i64: 8, 108>}, {pipeline_mode = #tpu.pipeline_mode<synchronous>, transform_indices = @transform_2, window_bounds = array<i64: 8, 1>}, {transform_indices = @transform_3, window_bounds = array<i64: 1, 8, 512>}]} {
    %c0 = arith.constant 0 : index
    %c0_0 = arith.constant 0 : index
    %0 = vector.load %arg3[%c0, %c0_0] : memref<8x108xf32, #tpu.memory_space<vmem>>, vector<8x108xf32>
    %c0_1 = arith.constant 0 : index
    %c0_2 = arith.constant 0 : index
    %c0_3 = arith.constant 0 : index
    %1 = vector.load %arg2[%c0_1, %c0_2, %c0_3] : memref<1x108x512xf32, #tpu.memory_space<vmem>>, vector<1x108x512xf32>
    %2 = vector.shape_cast %1 : vector<1x108x512xf32> to vector<108x512xf32>
    %cst = arith.constant dense<0.000000e+00> : vector<8x512xf32>
    %3 = tpu.matmul %0, %2, %cst {dimension_numbers = #tpu.dot_dimension_numbers<[1], [0], [0], [1], [0, 0, 1, 1], [], []>} : vector<8x108xf32>, vector<108x512xf32>, vector<8x512xf32> -> vector<8x512xf32>
    %c0_4 = arith.constant 0 : index
    %c0_5 = arith.constant 0 : index
    %4 = vector.load %arg4[%c0_4, %c0_5] : memref<8x1xf32, #tpu.memory_space<vmem>>, vector<8x1xf32>
    %5 = vector.broadcast %4 : vector<8x1xf32> to vector<8x512xf32>
    %6 = arith.addf %3, %5 : vector<8x512xf32>
    %c0_6 = arith.constant 0 : index
    %c0_7 = arith.constant 0 : index
    %c0_8 = arith.constant 0 : index
    %7 = vector.load %arg5[%c0_6, %c0_7, %c0_8] : memref<1x8x512xf32, #tpu.memory_space<vmem>>, vector<1x8x512xf32>
    %8 = vector.shape_cast %7 : vector<1x8x512xf32> to vector<8x512xf32>
    %9 = vector.shape_cast %6 : vector<8x512xf32> to vector<1x8x512xf32>
    tpu.vector_store %arg5[%c0_6, %c0_7, %c0_8], %9 {strides = array<i32>} : memref<1x8x512xf32, #tpu.memory_space<vmem>>, vector<1x8x512xf32>,
    return
  }
  func.func @transform_0(%arg0: i32, %arg1: i32) -> (i32, i32, i32) {
    %c0_i32 = arith.constant 0 : i32
    %c0_i32_0 = arith.constant 0 : i32
    return %arg0, %c0_i32, %arg1 : i32, i32, i32
  }
  func.func @transform_1(%arg0: i32, %arg1: i32) -> (i32, i32) {
    %c0_i32 = arith.constant 0 : i32
    %c0_i32_0 = arith.constant 0 : i32
    %c0_i32_1 = arith.constant 0 : i32
    return %c0_i32, %c0_i32_0 : i32, i32
  }
  func.func @transform_2(%arg0: i32, %arg1: i32) -> (i32, i32) {
    %c0_i32 = arith.constant 0 : i32
    %c0_i32_0 = arith.constant 0 : i32
    %c0_i32_1 = arith.constant 0 : i32
    return %c0_i32, %c0_i32_0 : i32, i32
  }
  func.func @transform_3(%arg0: i32, %arg1: i32) -> (i32, i32, i32) {
    %c0_i32 = arith.constant 0 : i32
    %c0_i32_0 = arith.constant 0 : i32
    return %arg0, %c0_i32, %arg1 : i32, i32, i32
  }
}

</mosaic_0001>

<bundles_post_ra>
// kernel: blockwise_conv3d.1
= control target key start
LH: loop header
LB: loop body
LE: loop exit
PB: predicated region body
PF: predicated region fallthrough
CT: control target
= control target key end

     0   :  { %s552_s12 = smov 0   ;;  %s554_s13 = smov 0   ;;  %s661_s0 = inlined_call_operand.vmem [shape: f32[2,108,512], index: 0, kind: input, shape index: {}]   ;;  %s662_s1 = inlined_call_operand.vmem [shape: f32[8,108], index: 1, kind: input, shape index: {}]   ;;  %s663_s2 = inlined_call_operand.vmem [shape: f32[8,1], index: 2, kind: input, shape index: {}]   ;;  %s664_s3 = inlined_call_operand.vmem [shape: f32[2,8,512], index: 3, kind: output, shape index: {}]  }
   0x1   :  { %s556_s14 = smov 0  }
   0x2 LB: > { %s25_s15 = sadd.s32 1, %s525_s13  ;;  %p465_p0 = scmp.ge.s32.totalorder %s529_s14, 1  ;;  %s529_s14 = sphi %s556_s14, %s13_s14   ;;  %s525_s13 = sphi %s554_s13, %s666_s13   ;;  %s521_s12 = sphi %s552_s12, %s665_s12  }
   0x3   : > { %p27_p1 = scmp.ge.s32.totalorder %s25_s15, 2  ;;  %p158_p2 = scmp.lt.s32.totalorder %s529_s14, 3 }
   0x5   : > { %s668_s15 = smov (%p27_p1, %s25_s15), 0  ;;  %p159_p3 = pnand %p465_p0, %p158_p2 }
   0x6   : > { %p191_p4 = scmp.lt.s32.totalorder (!%p159_p3), %s521_s12, 1 }
   0x7   : > { %162 = sbr.rel (%p159_p3) target bundleno = 180 (0xb4), region = 32 }
   0xc   : > { %s670_s12 = smov (!%p191_p4, %s521_s12), 1  ;;  %vm277_vm0 = vcmask 1043456   ;;  %v531_v8 = vmov 0   ;;  %v210_v53 = vld [vmem:[%s662_s1] sm:$0xff]  ;;  %vm273_vm1 = vcmask 883712  }
   0xd   : > { %s480_s16 = smul.u32 448, %s670_s12  ;;  %506 = vset.pattern.permute.xlu0 %v531_v8  ;;  %v267_v56 = vld [vmem:[%s663_s2] sm:$0xff]  ;;  %s479_s24 = sshll.u32 %s670_s12, 5 }
   0xe   : > { %270 = vperm.xlu0 %506, %v267_v56   ;;  %s208_s27 = scalar_lea.vmem %s664_s3, %s479_s24 }
   0xf   : > { %s576_s19 = scalar_lea.vmem %s661_s0, %s480_s16 }
  0x10   : > { %v265_v0 = vld [vmem:[%s576_s19 + $0x1b0] sm:$0xf]  ;;  %v266_v1 = vld [vmem:[%s576_s19 + $0x1b8] sm:$0xf]  ;;  %v263_v6 = vld [vmem:[%s576_s19 + $0x1a0] sm:$0xf] }
  0x11   : > { %v261_v2 = vld [vmem:[%s576_s19 + $0x190] sm:$0xff]  ;;  %473 = vmatpush.msk.msra.mxu2 %vm277_vm0, %v265_v0  ;;  %475 = vmatpush.msk.msra.mxu3 %vm277_vm0, %v266_v1  ;;  %v262_v3 = vld [vmem:[%s576_s19 + $0x198] sm:$0xff]  ;;  %v264_v7 = vld [vmem:[%s576_s19 + $0x1a8] sm:$0xf] }
  0x12   : > { %v257_v4 = vld [vmem:[%s576_s19 + $0x170] sm:$0xff]  ;;  %v258_v5 = vld [vmem:[%s576_s19 + $0x178] sm:$0xff]  ;;  %v259_v9 = vld [vmem:[%s576_s19 + $0x180] sm:$0xff]  ;;  %469 = vmatpush.msk.msra.mxu0 %vm277_vm0, %v263_v6  ;;  %471 = vmatpush.msk.msra.mxu1 %vm277_vm0, %v264_v7 }
  0x13   : > { %333 = vmatpush.msra.mxu2 %v261_v2  ;;  %353 = vmatpush.msra.mxu3 %v262_v3  ;;  %v260_v10 = vld [vmem:[%s576_s19 + $0x188] sm:$0xff]  ;;  %v253_v11 = vld [vmem:[%s576_s19 + $0x150] sm:$0xff]  ;;  %v254_v12 = vld [vmem:[%s576_s19 + $0x158] sm:$0xff] }
  0x14   : > { %v255_v13 = vld [vmem:[%s576_s19 + $0x160] sm:$0xff]  ;;  %v256_v14 = vld [vmem:[%s576_s19 + $0x168] sm:$0xff]  ;;  %293 = vmatpush.msra.mxu0 %v259_v9  ;;  %313 = vmatpush.msra.mxu1 %v260_v10  ;;  %v249_v15 = vld [vmem:[%s576_s19 + $0x130] sm:$0xff] }
  0x15   : > { %334 = vmatpush.msra.mxu2 %v257_v4  ;;  %354 = vmatpush.msra.mxu3 %v258_v5  ;;  %v250_v16 = vld [vmem:[%s576_s19 + $0x138] sm:$0xff]  ;;  %v251_v17 = vld [vmem:[%s576_s19 + $0x140] sm:$0xff]  ;;  %v252_v18 = vld [vmem:[%s576_s19 + $0x148] sm:$0xff] }
  0x16   : > { %294 = vmatpush.msra.mxu0 %v255_v13  ;;  %314 = vmatpush.msra.mxu1 %v256_v14  ;;  %v245_v19 = vld [vmem:[%s576_s19 + $0x110] sm:$0xff]  ;;  %v246_v20 = vld [vmem:[%s576_s19 + $0x118] sm:$0xff]  ;;  %v247_v21 = vld [vmem:[%s576_s19 + $0x120] sm:$0xff] }
  0x17   : > { %335 = vmatpush.msra.mxu2 %v253_v11  ;;  %355 = vmatpush.msra.mxu3 %v254_v12  ;;  %v248_v22 = vld [vmem:[%s576_s19 + $0x128] sm:$0xff]  ;;  %v241_v23 = vld [vmem:[%s576_s19 + $0xf0] sm:$0xff]  ;;  %v242_v24 = vld [vmem:[%s576_s19 + $0xf8] sm:$0xff] }
  0x18   : > { %295 = vmatpush.msra.mxu0 %v251_v17  ;;  %315 = vmatpush.msra.mxu1 %v252_v18  ;;  %v243_v25 = vld [vmem:[%s576_s19 + $0x100] sm:$0xff]  ;;  %v244_v26 = vld [vmem:[%s576_s19 + $0x108] sm:$0xff]  ;;  %v237_v27 = vld [vmem:[%s576_s19 + $0xd0] sm:$0xff] }
  0x19   : > { %336 = vmatpush.msra.mxu2 %v249_v15  ;;  %356 = vmatpush.msra.mxu3 %v250_v16  ;;  %v238_v28 = vld [vmem:[%s576_s19 + $0xd8] sm:$0xff]  ;;  %v239_v29 = vld [vmem:[%s576_s19 + $0xe0] sm:$0xff]  ;;  %v240_v30 = vld [vmem:[%s576_s19 + $0xe8] sm:$0xff] }
  0x1a   : > { %296 = vmatpush.msra.mxu0 %v247_v21  ;;  %316 = vmatpush.msra.mxu1 %v248_v22  ;;  %v233_v31 = vld [vmem:[%s576_s19 + $0xb0] sm:$0xff]  ;;  %v234_v32 = vld [vmem:[%s576_s19 + $0xb8] sm:$0xff]  ;;  %v235_v33 = vld [vmem:[%s576_s19 + $0xc0] sm:$0xff] }
  0x1b   : > { %337 = vmatpush.msra.mxu2 %v245_v19  ;;  %357 = vmatpush.msra.mxu3 %v246_v20  ;;  %v236_v34 = vld [vmem:[%s576_s19 + $0xc8] sm:$0xff]  ;;  %v229_v35 = vld [vmem:[%s576_s19 + $0x90] sm:$0xff]  ;;  %v230_v36 = vld [vmem:[%s576_s19 + $0x98] sm:$0xff] }
  0x1c   : > { %297 = vmatpush.msra.mxu0 %v243_v25  ;;  %317 = vmatpush.msra.mxu1 %v244_v26  ;;  %v231_v37 = vld [vmem:[%s576_s19 + $0xa0] sm:$0xff]  ;;  %v232_v38 = vld [vmem:[%s576_s19 + $0xa8] sm:$0xff]  ;;  %v225_v39 = vld [vmem:[%s576_s19 + $0x70] sm:$0xff] }
  0x1d   : > { %338 = vmatpush.msra.mxu2 %v241_v23  ;;  %358 = vmatpush.msra.mxu3 %v242_v24  ;;  %v226_v40 = vld [vmem:[%s576_s19 + $0x78] sm:$0xff]  ;;  %v227_v41 = vld [vmem:[%s576_s19 + $0x80] sm:$0xff]  ;;  %v228_v42 = vld [vmem:[%s576_s19 + $0x88] sm:$0xff] }
  0x1e   : > { %298 = vmatpush.msra.mxu0 %v239_v29  ;;  %318 = vmatpush.msra.mxu1 %v240_v30  ;;  %v221_v43 = vld [vmem:[%s576_s19 + $0x50] sm:$0xff]  ;;  %v222_v44 = vld [vmem:[%s576_s19 + $0x58] sm:$0xff]  ;;  %v223_v45 = vld [vmem:[%s576_s19 + $0x60] sm:$0xff] }
  0x1f   : > { %339 = vmatpush.msra.mxu2 %v237_v27  ;;  %359 = vmatpush.msra.mxu3 %v238_v28  ;;  %v224_v46 = vld [vmem:[%s576_s19 + $0x68] sm:$0xff]  ;;  %v217_v47 = vld [vmem:[%s576_s19 + $0x30] sm:$0xff]  ;;  %v218_v48 = vld [vmem:[%s576_s19 + $0x38] sm:$0xff] }
  0x20   : > { %299 = vmatpush.msra.mxu0 %v235_v33  ;;  %319 = vmatpush.msra.mxu1 %v236_v34  ;;  %v219_v49 = vld [vmem:[%s576_s19 + $0x40] sm:$0xff]  ;;  %v220_v50 = vld [vmem:[%s576_s19 + $0x48] sm:$0xff]  ;;  %v213_v51 = vld [vmem:[%s576_s19 + $0x10] sm:$0xff] }
  0x21   : > { %340 = vmatpush.msra.mxu2 %v233_v31  ;;  %360 = vmatpush.msra.mxu3 %v234_v32  ;;  %v214_v52 = vld [vmem:[%s576_s19 + $0x18] sm:$0xff]  ;;  %v215_v54 = vld [vmem:[%s576_s19 + $0x20] sm:$0xff]  ;;  %v216_v55 = vld [vmem:[%s576_s19 + $0x28] sm:$0xff] }
  0x22   : > { %300 = vmatpush.msra.mxu0 %v231_v37  ;;  %320 = vmatpush.msra.mxu1 %v232_v38  ;;  %v211_v57 = vld [vmem:[%s576_s19] sm:$0xff]  ;;  %v212_v58 = vld [vmem:[%s576_s19 + $0x8] sm:$0xff] }
  0x23   : > { %341 = vmatpush.msra.mxu2 %v229_v35  ;;  %361 = vmatpush.msra.mxu3 %v230_v36 }
  0x24   : > { %301 = vmatpush.msra.mxu0 %v227_v41  ;;  %321 = vmatpush.msra.mxu1 %v228_v42 }
  0x25   : > { %342 = vmatpush.msra.mxu2 %v225_v39  ;;  %362 = vmatpush.msra.mxu3 %v226_v40 }
  0x26   : > { %302 = vmatpush.msra.mxu0 %v223_v45  ;;  %322 = vmatpush.msra.mxu1 %v224_v46 }
  0x27   : > { %343 = vmatpush.msra.mxu2 %v221_v43  ;;  %363 = vmatpush.msra.mxu3 %v222_v44 }
  0x28   : > { %303 = vmatpush.msra.mxu0 %v219_v49  ;;  %323 = vmatpush.msra.mxu1 %v220_v50 }
  0x29   : > { %344 = vmatpush.msra.mxu2 %v217_v47  ;;  %364 = vmatpush.msra.mxu3 %v218_v48 }
  0x2a   : > { %304 = vmatpush.msra.mxu0 %v215_v54  ;;  %324 = vmatpush.msra.mxu1 %v216_v55 }
  0x2b   : > { %345 = vmatpush.msra.mxu2 %v213_v51  ;;  %365 = vmatpush.msra.mxu3 %v214_v52 }
  0x2c   : > { %474 = vmatmul.msk.f32.vlgmr.msra.gmra.mxu2 %vm273_vm1, %v210_v53  ;;  %476 = vmatmul.msk.f32.vlgmr.msra.gmra.mxu3 %vm273_vm1, %v210_v53 }
  0x2d   : > { %305 = vmatpush.msra.mxu0 %v211_v57  ;;  %325 = vmatpush.msra.mxu1 %v212_v58 }
  0x2e   : > { %470 = vmatmul.msk.f32.vlgmr.msra.gmra.mxu0 %vm273_vm1, %v210_v53  ;;  %472 = vmatmul.msk.f32.vlgmr.msra.gmra.mxu1 %vm273_vm1, %v210_v53 }
  0x80   : > { %v271_v59 = vpop.permute.xlu0 %270 }
  0xab   : > { %v307_v60 = vpop.f32.mrf.mxu0  ;;  %v327_v61 = vpop.f32.mrf.mxu1 }
  0xac   : > { %v308_v62 = vadd.f32 %v307_v60, %v271_v59  ;;  %v328_v63 = vadd.f32 %v327_v61, %v271_v59 }
  0xae   : > { %370 = vst [vmem:[%s208_s27] sm:$0xff] %v308_v62 }
  0xaf   : > { %v347_v0 = vpop.f32.mrf.mxu2  ;;  %v367_v1 = vpop.f32.mrf.mxu3  ;;  %371 = vst [vmem:[%s208_s27 + $0x8] sm:$0xff] %v328_v63 }
  0xb0   : > { %v348_v2 = vadd.f32 %v347_v0, %v271_v59  ;;  %v368_v3 = vadd.f32 %v367_v1, %v271_v59 }
  0xb2   : > { %372 = vst [vmem:[%s208_s27 + $0x10] sm:$0xff] %v348_v2 }
  0xb3   : > { %373 = vst [vmem:[%s208_s27 + $0x18] sm:$0xff] %v368_v3 }
  0xb4 PF: > { %s13_s14 = sadd.s32 1, %s529_s14   ;;  %s665_s12 = smov %s525_s13 }
  0xb5   : > { %p10_p5 = scmp.ge.s32.totalorder %s13_s14, 4   ;;  %s666_s13 = smov %s668_s15 }
  0xb7   :  { %12 = sbr.rel (!%p10_p5) target bundleno = 2 (0x2), region = 62 }

</bundles_post_ra>
